<compile_context>
chip_gen: v7x
topology: tpu7x:2x2x1
jax: 0.10.0
libtpu: 0.0.40
codegen_flags: <defaults>
</compile_context>

<pallas_src>
import functools

import jax
import jax.numpy as jnp
from jax.experimental import pallas as pl
from jax.experimental.pallas import tpu as pltpu


def _round_up(x: int, m: int) -> int:
    return ((x + m - 1) // m) * m


def _encoder_kernel(x_ref,
                    w1_ref, b1_ref, g1_ref, bt1_ref,
                    w2_ref, b2_ref, g2_ref, bt2_ref,
                    w3_ref, b3_ref,
                    out_ref, *, eps: float, hidden_true: int, hidden_pad: int):
    """One batch tile: (TB, d_in_pad) bf16 -> (TB, d_lat_pad) f32."""
    inv_h = 1.0 / float(hidden_true)

    # Mask of the "real" hidden columns (padded columns are exactly zero
    # after every padded linear layer, since their weights/bias are zero).
    if hidden_pad != hidden_true:
        col = jax.lax.broadcasted_iota(jnp.int32, (1, hidden_pad), 1)
        lane_mask = col < hidden_true
    else:
        lane_mask = None

    def linear(h_bf16, w_ref, b_ref):
        # bf16 x bf16 on the MXU, f32 accumulation, f32 bias add.
        return jnp.dot(h_bf16, w_ref[...],
                       preferred_element_type=jnp.float32) + b_ref[...]

    def layer_norm(h, g_ref, b_ref):
        # Sums divided by the *true* hidden width; padded columns contribute 0.
        mean = jnp.sum(h, axis=-1, keepdims=True) * inv_h
        c = h - mean
        if lane_mask is not None:
            c = jnp.where(lane_mask, c, 0.0)
        var = jnp.sum(c * c, axis=-1, keepdims=True) * inv_h
        inv = jax.lax.rsqrt(var + eps)                       # EUP rsqrt
        return c * inv * g_ref[...] + b_ref[...]

    x = x_ref[...]                                           # (TB, d_in_pad) bf16

    # Block 1: Linear -> LayerNorm -> ReLU -> Dropout (identity, eval mode)
    h = linear(x, w1_ref, b1_ref)                            # f32
    h = layer_norm(h, g1_ref, bt1_ref)
    h = jnp.maximum(h, 0.0)
    # TODO(synk): training-mode Dropout(0.1) would use pltpu.prng_seed +
    # pltpu.stateful_bernoulli here; forward is implemented in eval mode.

    # Block 2: Linear -> LayerNorm -> ReLU -> Dropout (identity, eval mode)
    h = linear(h.astype(jnp.bfloat16), w2_ref, b2_ref)
    h = layer_norm(h, g2_ref, bt2_ref)
    h = jnp.maximum(h, 0.0)

    # Output projection.
    out_ref[...] = linear(h.astype(jnp.bfloat16), w3_ref, b3_ref)


def _resident_spec(shape, single_buffer: bool):
    """Weight/param block: same block every grid step -> stays in VMEM."""
    index_map = lambda i: (0, 0)
    if single_buffer and hasattr(pl, "Buffered"):
        try:
            # Constant index_map never changes blocks, so one buffer suffices.
            return pl.BlockSpec(shape, index_map, pipeline_mode=pl.Buffered(1))
        except TypeError:  # older jax: no pipeline_mode kwarg
            pass
    return pl.BlockSpec(shape, index_map)


def encoder_forward(x: jax.Array, params: dict, *, eps: float = 1e-5,
                    batch_tile: int = 512) -> jax.Array:
    """Forward pass of Encoder (eval mode).

    Args:
      x: (..., d_in) float input.
      params: dict with w1 (d_in, hidden), b1/g1/beta1 (1, hidden),
        w2 (hidden, hidden), b2/g2/beta2 (1, hidden), w3 (hidden, d_lat),
        b3 (1, d_lat).  (Linear weights stored as (in, out) == torch weight.T)
      eps: LayerNorm epsilon (PyTorch default 1e-5).
      batch_tile: max rows per grid step.

    Returns:
      (..., d_lat) float32 output.
    """
    orig_shape = x.shape
    d_in = orig_shape[-1]
    x2d = x.reshape(-1, d_in)
    B = x2d.shape[0]

    hidden = params["w1"].shape[1]
    d_lat = params["w3"].shape[1]
    assert params["w1"].shape[0] == d_in

    LANE = 128   # lane alignment for all matmul K/N dims
    SUB = 16     # sublane granularity for bf16 activation tiles
    d_in_p = _round_up(d_in, LANE)
    h_p = _round_up(hidden, LANE)
    dl_p = _round_up(d_lat, LANE)

    # ---- batch tiling ----
    b_ceil = _round_up(B, SUB)
    tb = min(batch_tile, b_ceil)
    if b_ceil >= 2 * SUB:
        # v7x megacore: keep >= 2 grid steps so both TensorCores get work.
        tb = min(tb, _round_up(pl.cdiv(b_ceil, 2), SUB))
    n_steps = pl.cdiv(b_ceil, tb)
    b_pad = n_steps * tb

    # ---- pad + cast operands (weights -> bf16 for the MXU; LN/bias stay f32) ----
    def pad2(a, rows, cols, dtype):
        a = jnp.asarray(a)
        if a.ndim == 1:
            a = a.reshape(1, -1)
        pr, pc = rows - a.shape[0], cols - a.shape[1]
        if pr or pc:
            a = jnp.pad(a, ((0, pr), (0, pc)))
        return a.astype(dtype)

    x_p = pad2(x2d, b_pad, d_in_p, jnp.bfloat16)
    w1 = pad2(params["w1"], d_in_p, h_p, jnp.bfloat16)
    b1 = pad2(params["b1"], 1, h_p, jnp.float32)
    g1 = pad2(params["g1"], 1, h_p, jnp.float32)
    bt1 = pad2(params["beta1"], 1, h_p, jnp.float32)
    w2 = pad2(params["w2"], h_p, h_p, jnp.bfloat16)
    b2 = pad2(params["b2"], 1, h_p, jnp.float32)
    g2 = pad2(params["g2"], 1, h_p, jnp.float32)
    bt2 = pad2(params["beta2"], 1, h_p, jnp.float32)
    w3 = pad2(params["w3"], h_p, dl_p, jnp.bfloat16)
    b3 = pad2(params["b3"], 1, dl_p, jnp.float32)

    # ---- VMEM budget (single-buffered bf16 weights + double-buffered I/O) ----
    BF16, F32 = 2, 4
    w_bytes = (d_in_p * h_p + h_p * h_p + h_p * dl_p) * BF16
    p_bytes = (6 * h_p + dl_p) * F32
    io_bytes = 2 * tb * d_in_p * BF16 + 2 * tb * dl_p * F32
    work_bytes = 6 * tb * h_p * F32          # headroom for f32 intermediates
    vmem_needed = w_bytes + p_bytes + io_bytes + work_bytes
    vmem_limit = min(max(int(vmem_needed * 1.25) + (4 << 20), 32 << 20), 112 << 20)
    # TODO(synk): if resident weights exceed ~75% of physical VMEM (64 MiB on
    # v7x), fall back to a second "arbitrary" K-tiled grid axis over hidden.

    flops = 2 * B * (d_in * hidden + hidden * hidden + hidden * d_lat)
    bytes_accessed = x_p.size * BF16 + b_pad * dl_p * F32 + w_bytes + p_bytes
    cost = pl.CostEstimate(flops=flops, transcendentals=2 * B,
                           bytes_accessed=bytes_accessed)

    kernel = functools.partial(_encoder_kernel, eps=float(eps),
                               hidden_true=hidden, hidden_pad=h_p)

    def build(single_buffer: bool):
        res = lambda shape: _resident_spec(shape, single_buffer)
        return pl.pallas_call(
            kernel,
            out_shape=jax.ShapeDtypeStruct((b_pad, dl_p), jnp.float32),
            grid_spec=pltpu.PrefetchScalarGridSpec(
                num_scalar_prefetch=0,
                grid=(n_steps,),
                in_specs=[
                    pl.BlockSpec((tb, d_in_p), lambda i: (i, 0)),   # x tile
                    res((d_in_p, h_p)),                             # w1
                    res((1, h_p)), res((1, h_p)), res((1, h_p)),    # b1, g1, beta1
                    res((h_p, h_p)),                                # w2
                    res((1, h_p)), res((1, h_p)), res((1, h_p)),    # b2, g2, beta2
                    res((h_p, dl_p)),                               # w3
                    res((1, dl_p)),                                 # b3
                ],
                out_specs=pl.BlockSpec((tb, dl_p), lambda i: (i, 0)),
            ),
            compiler_params=pltpu.CompilerParams(
                dimension_semantics=("parallel",),
                vmem_limit_bytes=vmem_limit,
            ),
            cost_estimate=cost,
        )

    args = (x_p, w1, b1, g1, bt1, w2, b2, g2, bt2, w3, b3)
    try:
        out = build(single_buffer=True)(*args)
    except Exception:
        # Portability fallback (e.g. jax without pl.Buffered single-buffering).
        out = build(single_buffer=False)(*args)

    out = out[:B, :d_lat]
    return out.reshape(orig_shape[:-1] + (d_lat,))


def _reference(x, p, eps=1e-5):
    """Pure-JAX reference (eval mode), matmul operands rounded to bf16
    like the kernel, accumulation in f32."""
    def mm(h, w):
        return jnp.dot(h.astype(jnp.bfloat16).astype(jnp.float32),
                       w.astype(jnp.bfloat16).astype(jnp.float32),
                       precision=jax.lax.Precision.HIGHEST)

    def ln(h, g, b):
        mean = h.mean(-1, keepdims=True)
        var = ((h - mean) ** 2).mean(-1, keepdims=True)
        return (h - mean) / jnp.sqrt(var + eps) * g + b

    h = mm(x, p["w1"]) + p["b1"]
    h = jax.nn.relu(ln(h, p["g1"], p["beta1"]))
    h = mm(h, p["w2"]) + p["b2"]
    h = jax.nn.relu(ln(h, p["g2"], p["beta2"]))
    return mm(h, p["w3"]) + p["b3"]


def _init_params(key, d_in, hidden, d_lat):
    ks = jax.random.split(key, 6)
    return {
        # Linear weights stored as (in, out) == PyTorch weight.T
        "w1": jax.random.normal(ks[0], (d_in, hidden), jnp.float32) * 0.1,
        "b1": jax.random.normal(ks[1], (1, hidden), jnp.float32) * 0.1,
        "g1": jnp.ones((1, hidden), jnp.float32),
        "beta1": jnp.zeros((1, hidden), jnp.float32),
        "w2": jax.random.normal(ks[2], (hidden, hidden), jnp.float32) * 0.1,
        "b2": jax.random.normal(ks[3], (1, hidden), jnp.float32) * 0.1,
        "g2": jnp.ones((1, hidden), jnp.float32),
        "beta2": jnp.zeros((1, hidden), jnp.float32),
        "w3": jax.random.normal(ks[4], (hidden, d_lat), jnp.float32) * 0.1,
        "b3": jax.random.normal(ks[5], (1, d_lat), jnp.float32) * 0.1,
    }


if __name__ == "__main__":
    key = jax.random.PRNGKey(0)
    k_x, k_p = jax.random.split(key)

    batch, d_in, hidden, d_lat = 8, 16, 32, 8

    x = jax.random.normal(k_x, (batch, d_in), dtype=jnp.float32)
    params = _init_params(k_p, d_in, hidden, d_lat)

    y = encoder_forward(x, params)
    jax.block_until_ready(y)

    y_ref = _reference(x, params)
    assert y.shape == (batch, d_lat), f"bad output shape {y.shape}"
    err = jnp.max(jnp.abs(y - y_ref))
    assert jnp.allclose(y, y_ref, atol=1e-2, rtol=1e-2), f"mismatch, max err {err}"

    print("KERNEL_OK")
</pallas_src>

<mosaic_0001>
module attributes {stable_mosaic.version = 11 : i64} {
  func.func @_encoder_kernel(%arg0: i32, %arg1: memref<16x128xbf16, #tpu.memory_space<vmem>>, %arg2: memref<128x128xbf16, #tpu.memory_space<vmem>>, %arg3: memref<1x128xf32, #tpu.memory_space<vmem>>, %arg4: memref<1x128xf32, #tpu.memory_space<vmem>>, %arg5: memref<1x128xf32, #tpu.memory_space<vmem>>, %arg6: memref<128x128xbf16, #tpu.memory_space<vmem>>, %arg7: memref<1x128xf32, #tpu.memory_space<vmem>>, %arg8: memref<1x128xf32, #tpu.memory_space<vmem>>, %arg9: memref<1x128xf32, #tpu.memory_space<vmem>>, %arg10: memref<128x128xbf16, #tpu.memory_space<vmem>>, %arg11: memref<1x128xf32, #tpu.memory_space<vmem>>, %arg12: memref<16x128xf32, #tpu.memory_space<vmem>>) attributes {dimension_semantics = [#tpu.dimension_semantics<parallel>], iteration_bounds = array<i64: 1>, scalar_prefetch = 0 : i64, scratch_operands = 0 : i64, tpu.core_type = #tpu.core_type<tc>, window_params = [{transform_indices = @transform_0, window_bounds = array<i64: 16, 128>}, {pipeline_mode = #tpu.pipeline_mode<synchronous>, transform_indices = @transform_1, window_bounds = array<i64: 128, 128>}, {pipeline_mode = #tpu.pipeline_mode<synchronous>, transform_indices = @transform_2, window_bounds = array<i64: 1, 128>}, {pipeline_mode = #tpu.pipeline_mode<synchronous>, transform_indices = @transform_3, window_bounds = array<i64: 1, 128>}, {pipeline_mode = #tpu.pipeline_mode<synchronous>, transform_indices = @transform_4, window_bounds = array<i64: 1, 128>}, {pipeline_mode = #tpu.pipeline_mode<synchronous>, transform_indices = @transform_5, window_bounds = array<i64: 128, 128>}, {pipeline_mode = #tpu.pipeline_mode<synchronous>, transform_indices = @transform_6, window_bounds = array<i64: 1, 128>}, {pipeline_mode = #tpu.pipeline_mode<synchronous>, transform_indices = @transform_7, window_bounds = array<i64: 1, 128>}, {pipeline_mode = #tpu.pipeline_mode<synchronous>, transform_indices = @transform_8, window_bounds = array<i64: 1, 128>}, {pipeline_mode = #tpu.pipeline_mode<synchronous>, transform_indices = @transform_9, window_bounds = array<i64: 128, 128>}, {pipeline_mode = #tpu.pipeline_mode<synchronous>, transform_indices = @transform_10, window_bounds = array<i64: 1, 128>}, {transform_indices = @transform_11, window_bounds = array<i64: 16, 128>}]} {
    %0 = tpu.iota {dimensions = array<i32: 1>} : vector<1x128xi32>
    %c32_i32 = arith.constant 32 : i32
    %1 = vector.broadcast %c32_i32 : i32 to vector<1x128xi32>
    %2 = arith.cmpi slt, %0, %1 : vector<1x128xi32>
    %c0 = arith.constant 0 : index
    %c0_0 = arith.constant 0 : index
    %3 = vector.load %arg1[%c0, %c0_0] : memref<16x128xbf16, #tpu.memory_space<vmem>>, vector<16x128xbf16>
    %c0_1 = arith.constant 0 : index
    %c0_2 = arith.constant 0 : index
    %4 = vector.load %arg2[%c0_1, %c0_2] : memref<128x128xbf16, #tpu.memory_space<vmem>>, vector<128x128xbf16>
    %cst = arith.constant dense<0.000000e+00> : vector<16x128xf32>
    %5 = tpu.matmul %3, %4, %cst {dimension_numbers = #tpu.dot_dimension_numbers<[1], [0], [0], [1], [0, 0, 1, 1], [], []>} : vector<16x128xbf16>, vector<128x128xbf16>, vector<16x128xf32> -> vector<16x128xf32>
    %c0_3 = arith.constant 0 : index
    %c0_4 = arith.constant 0 : index
    %6 = vector.load %arg3[%c0_3, %c0_4] : memref<1x128xf32, #tpu.memory_space<vmem>>, vector<1x128xf32>
    %7 = vector.broadcast %6 : vector<1x128xf32> to vector<16x128xf32>
    %8 = arith.addf %5, %7 : vector<16x128xf32>
    %cst_5 = arith.constant dense<0.000000e+00> : vector<16xf32>
    %9 = vector.multi_reduction <add>, %8, %cst_5 [1] : vector<16x128xf32> to vector<16xf32>
    %10 = vector.shape_cast %9 : vector<16xf32> to vector<16x1xf32>
    %cst_6 = arith.constant 3.125000e-02 : f32
    %11 = vector.broadcast %cst_6 : f32 to vector<16x1xf32>
    %12 = arith.mulf %10, %11 : vector<16x1xf32>
    %13 = vector.broadcast %12 : vector<16x1xf32> to vector<16x128xf32>
    %14 = arith.subf %8, %13 : vector<16x128xf32>
    %cst_7 = arith.constant 0.000000e+00 : f32
    %15 = vector.shape_cast %2 : vector<1x128xi1> to vector<1x128xi1>
    %16 = vector.broadcast %15 : vector<1x128xi1> to vector<16x128xi1>
    %17 = vector.broadcast %cst_7 : f32 to vector<16x128xf32>
    %18 = arith.select %16, %14, %17 : vector<16x128xi1>, vector<16x128xf32>
    %19 = arith.mulf %18, %18 : vector<16x128xf32>
    %cst_8 = arith.constant dense<0.000000e+00> : vector<16xf32>
    %20 = vector.multi_reduction <add>, %19, %cst_8 [1] : vector<16x128xf32> to vector<16xf32>
    %21 = vector.shape_cast %20 : vector<16xf32> to vector<16x1xf32>
    %cst_9 = arith.constant 3.125000e-02 : f32
    %22 = vector.broadcast %cst_9 : f32 to vector<16x1xf32>
    %23 = arith.mulf %21, %22 : vector<16x1xf32>
    %cst_10 = arith.constant 9.99999974E-6 : f32
    %24 = vector.broadcast %cst_10 : f32 to vector<16x1xf32>
    %25 = arith.addf %23, %24 : vector<16x1xf32>
    %26 = math.rsqrt %25 : vector<16x1xf32>
    %27 = vector.broadcast %26 : vector<16x1xf32> to vector<16x128xf32>
    %28 = arith.mulf %18, %27 : vector<16x128xf32>
    %c0_11 = arith.constant 0 : index
    %c0_12 = arith.constant 0 : index
    %29 = vector.load %arg4[%c0_11, %c0_12] : memref<1x128xf32, #tpu.memory_space<vmem>>, vector<1x128xf32>
    %30 = vector.broadcast %29 : vector<1x128xf32> to vector<16x128xf32>
    %31 = arith.mulf %28, %30 : vector<16x128xf32>
    %c0_13 = arith.constant 0 : index
    %c0_14 = arith.constant 0 : index
    %32 = vector.load %arg5[%c0_13, %c0_14] : memref<1x128xf32, #tpu.memory_space<vmem>>, vector<1x128xf32>
    %33 = vector.broadcast %32 : vector<1x128xf32> to vector<16x128xf32>
    %34 = arith.addf %31, %33 : vector<16x128xf32>
    %cst_15 = arith.constant 0.000000e+00 : f32
    %35 = vector.broadcast %cst_15 : f32 to vector<16x128xf32>
    %36 = arith.maximumf %34, %35 : vector<16x128xf32>
    %37 = arith.truncf %36 : vector<16x128xf32> to vector<16x128xbf16>
    %c0_16 = arith.constant 0 : index
    %c0_17 = arith.constant 0 : index
    %38 = vector.load %arg6[%c0_16, %c0_17] : memref<128x128xbf16, #tpu.memory_space<vmem>>, vector<128x128xbf16>
    %cst_18 = arith.constant dense<0.000000e+00> : vector<16x128xf32>
    %39 = tpu.matmul %37, %38, %cst_18 {dimension_numbers = #tpu.dot_dimension_numbers<[1], [0], [0], [1], [0, 0, 1, 1], [], []>} : vector<16x128xbf16>, vector<128x128xbf16>, vector<16x128xf32> -> vector<16x128xf32>
    %c0_19 = arith.constant 0 : index
    %c0_20 = arith.constant 0 : index
    %40 = vector.load %arg7[%c0_19, %c0_20] : memref<1x128xf32, #tpu.memory_space<vmem>>, vector<1x128xf32>
    %41 = vector.broadcast %40 : vector<1x128xf32> to vector<16x128xf32>
    %42 = arith.addf %39, %41 : vector<16x128xf32>
    %cst_21 = arith.constant dense<0.000000e+00> : vector<16xf32>
    %43 = vector.multi_reduction <add>, %42, %cst_21 [1] : vector<16x128xf32> to vector<16xf32>
    %44 = vector.shape_cast %43 : vector<16xf32> to vector<16x1xf32>
    %cst_22 = arith.constant 3.125000e-02 : f32
    %45 = vector.broadcast %cst_22 : f32 to vector<16x1xf32>
    %46 = arith.mulf %44, %45 : vector<16x1xf32>
    %47 = vector.broadcast %46 : vector<16x1xf32> to vector<16x128xf32>
    %48 = arith.subf %42, %47 : vector<16x128xf32>
    %cst_23 = arith.constant 0.000000e+00 : f32
    %49 = vector.shape_cast %2 : vector<1x128xi1> to vector<1x128xi1>
    %50 = vector.broadcast %49 : vector<1x128xi1> to vector<16x128xi1>
    %51 = vector.broadcast %cst_23 : f32 to vector<16x128xf32>
    %52 = arith.select %50, %48, %51 : vector<16x128xi1>, vector<16x128xf32>
    %53 = arith.mulf %52, %52 : vector<16x128xf32>
    %cst_24 = arith.constant dense<0.000000e+00> : vector<16xf32>
    %54 = vector.multi_reduction <add>, %53, %cst_24 [1] : vector<16x128xf32> to vector<16xf32>
    %55 = vector.shape_cast %54 : vector<16xf32> to vector<16x1xf32>
    %cst_25 = arith.constant 3.125000e-02 : f32
    %56 = vector.broadcast %cst_25 : f32 to vector<16x1xf32>
    %57 = arith.mulf %55, %56 : vector<16x1xf32>
    %cst_26 = arith.constant 9.99999974E-6 : f32
    %58 = vector.broadcast %cst_26 : f32 to vector<16x1xf32>
    %59 = arith.addf %57, %58 : vector<16x1xf32>
    %60 = math.rsqrt %59 : vector<16x1xf32>
    %61 = vector.broadcast %60 : vector<16x1xf32> to vector<16x128xf32>
    %62 = arith.mulf %52, %61 : vector<16x128xf32>
    %c0_27 = arith.constant 0 : index
    %c0_28 = arith.constant 0 : index
    %63 = vector.load %arg8[%c0_27, %c0_28] : memref<1x128xf32, #tpu.memory_space<vmem>>, vector<1x128xf32>
    %64 = vector.broadcast %63 : vector<1x128xf32> to vector<16x128xf32>
    %65 = arith.mulf %62, %64 : vector<16x128xf32>
    %c0_29 = arith.constant 0 : index
    %c0_30 = arith.constant 0 : index
    %66 = vector.load %arg9[%c0_29, %c0_30] : memref<1x128xf32, #tpu.memory_space<vmem>>, vector<1x128xf32>
    %67 = vector.broadcast %66 : vector<1x128xf32> to vector<16x128xf32>
    %68 = arith.addf %65, %67 : vector<16x128xf32>
    %cst_31 = arith.constant 0.000000e+00 : f32
    %69 = vector.broadcast %cst_31 : f32 to vector<16x128xf32>
    %70 = arith.maximumf %68, %69 : vector<16x128xf32>
    %71 = arith.truncf %70 : vector<16x128xf32> to vector<16x128xbf16>
    %c0_32 = arith.constant 0 : index
    %c0_33 = arith.constant 0 : index
    %72 = vector.load %arg10[%c0_32, %c0_33] : memref<128x128xbf16, #tpu.memory_space<vmem>>, vector<128x128xbf16>
    %cst_34 = arith.constant dense<0.000000e+00> : vector<16x128xf32>
    %73 = tpu.matmul %71, %72, %cst_34 {dimension_numbers = #tpu.dot_dimension_numbers<[1], [0], [0], [1], [0, 0, 1, 1], [], []>} : vector<16x128xbf16>, vector<128x128xbf16>, vector<16x128xf32> -> vector<16x128xf32>
    %c0_35 = arith.constant 0 : index
    %c0_36 = arith.constant 0 : index
    %74 = vector.load %arg11[%c0_35, %c0_36] : memref<1x128xf32, #tpu.memory_space<vmem>>, vector<1x128xf32>
    %75 = vector.broadcast %74 : vector<1x128xf32> to vector<16x128xf32>
    %76 = arith.addf %73, %75 : vector<16x128xf32>
    %c0_37 = arith.constant 0 : index
    %c0_38 = arith.constant 0 : index
    %77 = vector.load %arg12[%c0_37, %c0_38] : memref<16x128xf32, #tpu.memory_space<vmem>>, vector<16x128xf32>
    tpu.vector_store %arg12[%c0_37, %c0_38], %76 {strides = array<i32>} : memref<16x128xf32, #tpu.memory_space<vmem>>, vector<16x128xf32>,
    return
  }
  func.func @transform_0(%arg0: i32) -> (i32, i32) {
    %c0_i32 = arith.constant 0 : i32
    %c0_i32_0 = arith.constant 0 : i32
    return %arg0, %c0_i32 : i32, i32
  }
  func.func @transform_1(%arg0: i32) -> (i32, i32) {
    %c0_i32 = arith.constant 0 : i32
    %c0_i32_0 = arith.constant 0 : i32
    %c0_i32_1 = arith.constant 0 : i32
    return %c0_i32, %c0_i32_0 : i32, i32
  }
  func.func @transform_2(%arg0: i32) -> (i32, i32) {
    %c0_i32 = arith.constant 0 : i32
    %c0_i32_0 = arith.constant 0 : i32
    %c0_i32_1 = arith.constant 0 : i32
    return %c0_i32, %c0_i32_0 : i32, i32
  }
  func.func @transform_3(%arg0: i32) -> (i32, i32) {
    %c0_i32 = arith.constant 0 : i32
    %c0_i32_0 = arith.constant 0 : i32
    %c0_i32_1 = arith.constant 0 : i32
    return %c0_i32, %c0_i32_0 : i32, i32
  }
  func.func @transform_4(%arg0: i32) -> (i32, i32) {
    %c0_i32 = arith.constant 0 : i32
    %c0_i32_0 = arith.constant 0 : i32
    %c0_i32_1 = arith.constant 0 : i32
    return %c0_i32, %c0_i32_0 : i32, i32
  }
  func.func @transform_5(%arg0: i32) -> (i32, i32) {
    %c0_i32 = arith.constant 0 : i32
    %c0_i32_0 = arith.constant 0 : i32
    %c0_i32_1 = arith.constant 0 : i32
    return %c0_i32, %c0_i32_0 : i32, i32
  }
  func.func @transform_6(%arg0: i32) -> (i32, i32) {
    %c0_i32 = arith.constant 0 : i32
    %c0_i32_0 = arith.constant 0 : i32
    %c0_i32_1 = arith.constant 0 : i32
    return %c0_i32, %c0_i32_0 : i32, i32
  }
  func.func @transform_7(%arg0: i32) -> (i32, i32) {
    %c0_i32 = arith.constant 0 : i32
    %c0_i32_0 = arith.constant 0 : i32
    %c0_i32_1 = arith.constant 0 : i32
    return %c0_i32, %c0_i32_0 : i32, i32
  }
  func.func @transform_8(%arg0: i32) -> (i32, i32) {
    %c0_i32 = arith.constant 0 : i32
    %c0_i32_0 = arith.constant 0 : i32
    %c0_i32_1 = arith.constant 0 : i32
    return %c0_i32, %c0_i32_0 : i32, i32
  }
  func.func @transform_9(%arg0: i32) -> (i32, i32) {
    %c0_i32 = arith.constant 0 : i32
    %c0_i32_0 = arith.constant 0 : i32
    %c0_i32_1 = arith.constant 0 : i32
    return %c0_i32, %c0_i32_0 : i32, i32
  }
  func.func @transform_10(%arg0: i32) -> (i32, i32) {
    %c0_i32 = arith.constant 0 : i32
    %c0_i32_0 = arith.constant 0 : i32
    %c0_i32_1 = arith.constant 0 : i32
    return %c0_i32, %c0_i32_0 : i32, i32
  }
  func.func @transform_11(%arg0: i32) -> (i32, i32) {
    %c0_i32 = arith.constant 0 : i32
    %c0_i32_0 = arith.constant 0 : i32
    return %arg0, %c0_i32 : i32, i32
  }
}

module attributes {stable_mosaic.version = 11 : i64} {
  func.func @_encoder_kernel(%arg0: i32, %arg1: memref<16x128xbf16, #tpu.memory_space<vmem>>, %arg2: memref<128x128xbf16, #tpu.memory_space<vmem>>, %arg3: memref<1x128xf32, #tpu.memory_space<vmem>>, %arg4: memref<1x128xf32, #tpu.memory_space<vmem>>, %arg5: memref<1x128xf32, #tpu.memory_space<vmem>>, %arg6: memref<128x128xbf16, #tpu.memory_space<vmem>>, %arg7: memref<1x128xf32, #tpu.memory_space<vmem>>, %arg8: memref<1x128xf32, #tpu.memory_space<vmem>>, %arg9: memref<1x128xf32, #tpu.memory_space<vmem>>, %arg10: memref<128x128xbf16, #tpu.memory_space<vmem>>, %arg11: memref<1x128xf32, #tpu.memory_space<vmem>>, %arg12: memref<16x128xf32, #tpu.memory_space<vmem>>) attributes {dimension_semantics = [#tpu.dimension_semantics<parallel>], iteration_bounds = array<i64: 1>, scalar_prefetch = 0 : i64, scratch_operands = 0 : i64, tpu.core_type = #tpu.core_type<tc>, window_params = [{transform_indices = @transform_0, window_bounds = array<i64: 16, 128>}, {pipeline_mode = #tpu.pipeline_mode<synchronous>, transform_indices = @transform_1, window_bounds = array<i64: 128, 128>}, {pipeline_mode = #tpu.pipeline_mode<synchronous>, transform_indices = @transform_2, window_bounds = array<i64: 1, 128>}, {pipeline_mode = #tpu.pipeline_mode<synchronous>, transform_indices = @transform_3, window_bounds = array<i64: 1, 128>}, {pipeline_mode = #tpu.pipeline_mode<synchronous>, transform_indices = @transform_4, window_bounds = array<i64: 1, 128>}, {pipeline_mode = #tpu.pipeline_mode<synchronous>, transform_indices = @transform_5, window_bounds = array<i64: 128, 128>}, {pipeline_mode = #tpu.pipeline_mode<synchronous>, transform_indices = @transform_6, window_bounds = array<i64: 1, 128>}, {pipeline_mode = #tpu.pipeline_mode<synchronous>, transform_indices = @transform_7, window_bounds = array<i64: 1, 128>}, {pipeline_mode = #tpu.pipeline_mode<synchronous>, transform_indices = @transform_8, window_bounds = array<i64: 1, 128>}, {pipeline_mode = #tpu.pipeline_mode<synchronous>, transform_indices = @transform_9, window_bounds = array<i64: 128, 128>}, {pipeline_mode = #tpu.pipeline_mode<synchronous>, transform_indices = @transform_10, window_bounds = array<i64: 1, 128>}, {transform_indices = @transform_11, window_bounds = array<i64: 16, 128>}]} {
    %0 = tpu.iota {dimensions = array<i32: 1>} : vector<1x128xi32>
    %c32_i32 = arith.constant 32 : i32
    %1 = vector.broadcast %c32_i32 : i32 to vector<1x128xi32>
    %2 = arith.cmpi slt, %0, %1 : vector<1x128xi32>
    %c0 = arith.constant 0 : index
    %c0_0 = arith.constant 0 : index
    %3 = vector.load %arg1[%c0, %c0_0] : memref<16x128xbf16, #tpu.memory_space<vmem>>, vector<16x128xbf16>
    %c0_1 = arith.constant 0 : index
    %c0_2 = arith.constant 0 : index
    %4 = vector.load %arg2[%c0_1, %c0_2] : memref<128x128xbf16, #tpu.memory_space<vmem>>, vector<128x128xbf16>
    %cst = arith.constant dense<0.000000e+00> : vector<16x128xf32>
    %5 = tpu.matmul %3, %4, %cst {dimension_numbers = #tpu.dot_dimension_numbers<[1], [0], [0], [1], [0, 0, 1, 1], [], []>} : vector<16x128xbf16>, vector<128x128xbf16>, vector<16x128xf32> -> vector<16x128xf32>
    %c0_3 = arith.constant 0 : index
    %c0_4 = arith.constant 0 : index
    %6 = vector.load %arg3[%c0_3, %c0_4] : memref<1x128xf32, #tpu.memory_space<vmem>>, vector<1x128xf32>
    %7 = vector.broadcast %6 : vector<1x128xf32> to vector<16x128xf32>
    %8 = arith.addf %5, %7 : vector<16x128xf32>
    %cst_5 = arith.constant dense<0.000000e+00> : vector<16xf32>
    %9 = vector.multi_reduction <add>, %8, %cst_5 [1] : vector<16x128xf32> to vector<16xf32>
    %10 = vector.shape_cast %9 : vector<16xf32> to vector<16x1xf32>
    %cst_6 = arith.constant 3.125000e-02 : f32
    %11 = vector.broadcast %cst_6 : f32 to vector<16x1xf32>
    %12 = arith.mulf %10, %11 : vector<16x1xf32>
    %13 = vector.broadcast %12 : vector<16x1xf32> to vector<16x128xf32>
    %14 = arith.subf %8, %13 : vector<16x128xf32>
    %cst_7 = arith.constant 0.000000e+00 : f32
    %15 = vector.shape_cast %2 : vector<1x128xi1> to vector<1x128xi1>
    %16 = vector.broadcast %15 : vector<1x128xi1> to vector<16x128xi1>
    %17 = vector.broadcast %cst_7 : f32 to vector<16x128xf32>
    %18 = arith.select %16, %14, %17 : vector<16x128xi1>, vector<16x128xf32>
    %19 = arith.mulf %18, %18 : vector<16x128xf32>
    %cst_8 = arith.constant dense<0.000000e+00> : vector<16xf32>
    %20 = vector.multi_reduction <add>, %19, %cst_8 [1] : vector<16x128xf32> to vector<16xf32>
    %21 = vector.shape_cast %20 : vector<16xf32> to vector<16x1xf32>
    %cst_9 = arith.constant 3.125000e-02 : f32
    %22 = vector.broadcast %cst_9 : f32 to vector<16x1xf32>
    %23 = arith.mulf %21, %22 : vector<16x1xf32>
    %cst_10 = arith.constant 9.99999974E-6 : f32
    %24 = vector.broadcast %cst_10 : f32 to vector<16x1xf32>
    %25 = arith.addf %23, %24 : vector<16x1xf32>
    %26 = math.rsqrt %25 : vector<16x1xf32>
    %27 = vector.broadcast %26 : vector<16x1xf32> to vector<16x128xf32>
    %28 = arith.mulf %18, %27 : vector<16x128xf32>
    %c0_11 = arith.constant 0 : index
    %c0_12 = arith.constant 0 : index
    %29 = vector.load %arg4[%c0_11, %c0_12] : memref<1x128xf32, #tpu.memory_space<vmem>>, vector<1x128xf32>
    %30 = vector.broadcast %29 : vector<1x128xf32> to vector<16x128xf32>
    %31 = arith.mulf %28, %30 : vector<16x128xf32>
    %c0_13 = arith.constant 0 : index
    %c0_14 = arith.constant 0 : index
    %32 = vector.load %arg5[%c0_13, %c0_14] : memref<1x128xf32, #tpu.memory_space<vmem>>, vector<1x128xf32>
    %33 = vector.broadcast %32 : vector<1x128xf32> to vector<16x128xf32>
    %34 = arith.addf %31, %33 : vector<16x128xf32>
    %cst_15 = arith.constant 0.000000e+00 : f32
    %35 = vector.broadcast %cst_15 : f32 to vector<16x128xf32>
    %36 = arith.maximumf %34, %35 : vector<16x128xf32>
    %37 = arith.truncf %36 : vector<16x128xf32> to vector<16x128xbf16>
    %c0_16 = arith.constant 0 : index
    %c0_17 = arith.constant 0 : index
    %38 = vector.load %arg6[%c0_16, %c0_17] : memref<128x128xbf16, #tpu.memory_space<vmem>>, vector<128x128xbf16>
    %cst_18 = arith.constant dense<0.000000e+00> : vector<16x128xf32>
    %39 = tpu.matmul %37, %38, %cst_18 {dimension_numbers = #tpu.dot_dimension_numbers<[1], [0], [0], [1], [0, 0, 1, 1], [], []>} : vector<16x128xbf16>, vector<128x128xbf16>, vector<16x128xf32> -> vector<16x128xf32>
    %c0_19 = arith.constant 0 : index
    %c0_20 = arith.constant 0 : index
    %40 = vector.load %arg7[%c0_19, %c0_20] : memref<1x128xf32, #tpu.memory_space<vmem>>, vector<1x128xf32>
    %41 = vector.broadcast %40 : vector<1x128xf32> to vector<16x128xf32>
    %42 = arith.addf %39, %41 : vector<16x128xf32>
    %cst_21 = arith.constant dense<0.000000e+00> : vector<16xf32>
    %43 = vector.multi_reduction <add>, %42, %cst_21 [1] : vector<16x128xf32> to vector<16xf32>
    %44 = vector.shape_cast %43 : vector<16xf32> to vector<16x1xf32>
    %cst_22 = arith.constant 3.125000e-02 : f32
    %45 = vector.broadcast %cst_22 : f32 to vector<16x1xf32>
    %46 = arith.mulf %44, %45 : vector<16x1xf32>
    %47 = vector.broadcast %46 : vector<16x1xf32> to vector<16x128xf32>
    %48 = arith.subf %42, %47 : vector<16x128xf32>
    %cst_23 = arith.constant 0.000000e+00 : f32
    %49 = vector.shape_cast %2 : vector<1x128xi1> to vector<1x128xi1>
    %50 = vector.broadcast %49 : vector<1x128xi1> to vector<16x128xi1>
    %51 = vector.broadcast %cst_23 : f32 to vector<16x128xf32>
    %52 = arith.select %50, %48, %51 : vector<16x128xi1>, vector<16x128xf32>
    %53 = arith.mulf %52, %52 : vector<16x128xf32>
    %cst_24 = arith.constant dense<0.000000e+00> : vector<16xf32>
    %54 = vector.multi_reduction <add>, %53, %cst_24 [1] : vector<16x128xf32> to vector<16xf32>
    %55 = vector.shape_cast %54 : vector<16xf32> to vector<16x1xf32>
    %cst_25 = arith.constant 3.125000e-02 : f32
    %56 = vector.broadcast %cst_25 : f32 to vector<16x1xf32>
    %57 = arith.mulf %55, %56 : vector<16x1xf32>
    %cst_26 = arith.constant 9.99999974E-6 : f32
    %58 = vector.broadcast %cst_26 : f32 to vector<16x1xf32>
    %59 = arith.addf %57, %58 : vector<16x1xf32>
    %60 = math.rsqrt %59 : vector<16x1xf32>
    %61 = vector.broadcast %60 : vector<16x1xf32> to vector<16x128xf32>
    %62 = arith.mulf %52, %61 : vector<16x128xf32>
    %c0_27 = arith.constant 0 : index
    %c0_28 = arith.constant 0 : index
    %63 = vector.load %arg8[%c0_27, %c0_28] : memref<1x128xf32, #tpu.memory_space<vmem>>, vector<1x128xf32>
    %64 = vector.broadcast %63 : vector<1x128xf32> to vector<16x128xf32>
    %65 = arith.mulf %62, %64 : vector<16x128xf32>
    %c0_29 = arith.constant 0 : index
    %c0_30 = arith.constant 0 : index
    %66 = vector.load %arg9[%c0_29, %c0_30] : memref<1x128xf32, #tpu.memory_space<vmem>>, vector<1x128xf32>
    %67 = vector.broadcast %66 : vector<1x128xf32> to vector<16x128xf32>
    %68 = arith.addf %65, %67 : vector<16x128xf32>
    %cst_31 = arith.constant 0.000000e+00 : f32
    %69 = vector.broadcast %cst_31 : f32 to vector<16x128xf32>
    %70 = arith.maximumf %68, %69 : vector<16x128xf32>
    %71 = arith.truncf %70 : vector<16x128xf32> to vector<16x128xbf16>
    %c0_32 = arith.constant 0 : index
    %c0_33 = arith.constant 0 : index
    %72 = vector.load %arg10[%c0_32, %c0_33] : memref<128x128xbf16, #tpu.memory_space<vmem>>, vector<128x128xbf16>
    %cst_34 = arith.constant dense<0.000000e+00> : vector<16x128xf32>
    %73 = tpu.matmul %71, %72, %cst_34 {dimension_numbers = #tpu.dot_dimension_numbers<[1], [0], [0], [1], [0, 0, 1, 1], [], []>} : vector<16x128xbf16>, vector<128x128xbf16>, vector<16x128xf32> -> vector<16x128xf32>
    %c0_35 = arith.constant 0 : index
    %c0_36 = arith.constant 0 : index
    %74 = vector.load %arg11[%c0_35, %c0_36] : memref<1x128xf32, #tpu.memory_space<vmem>>, vector<1x128xf32>
    %75 = vector.broadcast %74 : vector<1x128xf32> to vector<16x128xf32>
    %76 = arith.addf %73, %75 : vector<16x128xf32>
    %c0_37 = arith.constant 0 : index
    %c0_38 = arith.constant 0 : index
    %77 = vector.load %arg12[%c0_37, %c0_38] : memref<16x128xf32, #tpu.memory_space<vmem>>, vector<16x128xf32>
    tpu.vector_store %arg12[%c0_37, %c0_38], %76 {strides = array<i32>} : memref<16x128xf32, #tpu.memory_space<vmem>>, vector<16x128xf32>,
    return
  }
  func.func @transform_0(%arg0: i32) -> (i32, i32) {
    %c0_i32 = arith.constant 0 : i32
    %c0_i32_0 = arith.constant 0 : i32
    return %arg0, %c0_i32 : i32, i32
  }
  func.func @transform_1(%arg0: i32) -> (i32, i32) {
    %c0_i32 = arith.constant 0 : i32
    %c0_i32_0 = arith.constant 0 : i32
    %c0_i32_1 = arith.constant 0 : i32
    return %c0_i32, %c0_i32_0 : i32, i32
  }
  func.func @transform_2(%arg0: i32) -> (i32, i32) {
    %c0_i32 = arith.constant 0 : i32
    %c0_i32_0 = arith.constant 0 : i32
    %c0_i32_1 = arith.constant 0 : i32
    return %c0_i32, %c0_i32_0 : i32, i32
  }
  func.func @transform_3(%arg0: i32) -> (i32, i32) {
    %c0_i32 = arith.constant 0 : i32
    %c0_i32_0 = arith.constant 0 : i32
    %c0_i32_1 = arith.constant 0 : i32
    return %c0_i32, %c0_i32_0 : i32, i32
  }
  func.func @transform_4(%arg0: i32) -> (i32, i32) {
    %c0_i32 = arith.constant 0 : i32
    %c0_i32_0 = arith.constant 0 : i32
    %c0_i32_1 = arith.constant 0 : i32
    return %c0_i32, %c0_i32_0 : i32, i32
  }
  func.func @transform_5(%arg0: i32) -> (i32, i32) {
    %c0_i32 = arith.constant 0 : i32
    %c0_i32_0 = arith.constant 0 : i32
    %c0_i32_1 = arith.constant 0 : i32
    return %c0_i32, %c0_i32_0 : i32, i32
  }
  func.func @transform_6(%arg0: i32) -> (i32, i32) {
    %c0_i32 = arith.constant 0 : i32
    %c0_i32_0 = arith.constant 0 : i32
    %c0_i32_1 = arith.constant 0 : i32
    return %c0_i32, %c0_i32_0 : i32, i32
  }
  func.func @transform_7(%arg0: i32) -> (i32, i32) {
    %c0_i32 = arith.constant 0 : i32
    %c0_i32_0 = arith.constant 0 : i32
    %c0_i32_1 = arith.constant 0 : i32
    return %c0_i32, %c0_i32_0 : i32, i32
  }
  func.func @transform_8(%arg0: i32) -> (i32, i32) {
    %c0_i32 = arith.constant 0 : i32
    %c0_i32_0 = arith.constant 0 : i32
    %c0_i32_1 = arith.constant 0 : i32
    return %c0_i32, %c0_i32_0 : i32, i32
  }
  func.func @transform_9(%arg0: i32) -> (i32, i32) {
    %c0_i32 = arith.constant 0 : i32
    %c0_i32_0 = arith.constant 0 : i32
    %c0_i32_1 = arith.constant 0 : i32
    return %c0_i32, %c0_i32_0 : i32, i32
  }
  func.func @transform_10(%arg0: i32) -> (i32, i32) {
    %c0_i32 = arith.constant 0 : i32
    %c0_i32_0 = arith.constant 0 : i32
    %c0_i32_1 = arith.constant 0 : i32
    return %c0_i32, %c0_i32_0 : i32, i32
  }
  func.func @transform_11(%arg0: i32) -> (i32, i32) {
    %c0_i32 = arith.constant 0 : i32
    %c0_i32_0 = arith.constant 0 : i32
    return %arg0, %c0_i32 : i32, i32
  }
}

</mosaic_0001>

<bundles_post_ra>
// kernel: tpu_custom_call.1
= control target key start
LH: loop header
LB: loop body
LE: loop exit
PB: predicated region body
PF: predicated region fallthrough
CT: control target
= control target key end

     0   :  { %16 = vsyncpa [#allocation3], 0  ;;  %s1055_s0 = inlined_call_operand.hbm [shape: bf16[16,128], index: 0, kind: input, shape index: {}]   ;;  %s1056_s1 = inlined_call_operand.hbm [shape: bf16[128,128], index: 1, kind: input, shape index: {}]   ;;  %s1057_s2 = inlined_call_operand.vmem [shape: f32[1,128], index: 2, kind: input, shape index: {}]   ;;  %s1058_s3 = inlined_call_operand.vmem [shape: f32[1,128], index: 3, kind: input, shape index: {}]   ;;  %s1059_s4 = inlined_call_operand.vmem [shape: f32[1,128], index: 4, kind: input, shape index: {}]   ;;  %s1060_s5 = inlined_call_operand.hbm [shape: bf16[128,128], index: 5, kind: input, shape index: {}]   ;;  %s1061_s6 = inlined_call_operand.vmem [shape: f32[1,128], index: 6, kind: input, shape index: {}]   ;;  %s1062_s7 = inlined_call_operand.vmem [shape: f32[1,128], index: 7, kind: input, shape index: {}]   ;;  %s1063_s8 = inlined_call_operand.vmem [shape: f32[1,128], index: 8, kind: input, shape index: {}]   ;;  %s1064_s9 = inlined_call_operand.hbm [shape: bf16[128,128], index: 9, kind: input, shape index: {}]   ;;  %s1065_s10 = inlined_call_operand.vmem [shape: f32[1,128], index: 10, kind: input, shape index: {}]   ;;  %s1066_s11 = inlined_call_operand.hbm [shape: f32[16,128], index: 11, kind: output, shape index: {}]  }
   0x1   :  { %17 = vsyncpa [#allocation6], 0 }
   0x2   :  { %18 = vsyncpa [#allocation9], 0 }
   0x3   :  { %19 = vsyncpa [#allocation4], 0  ;;  %s836_s17 = smov [#allocation5]   ;;  %s837_s19 = smov [#allocation2]  }
   0x4   :  { %s37_s18 = sshll.u32 %s836_s17, 4  ;;  %s25_s20 = sshll.u32 %s837_s19, 4  ;;  %s38_s18 = int_to_ptr.vmem [resolvable:$true] %s37_s18  ;;  %s907_s20 = int_to_ptr.vmem [resolvable:$true] %s25_s20 }
   0x5   :  { %s718_s23 = scalar_lea.hbm %s1056_s1, 1024 }
   0x6   :  { %p719_p0 = scmp.ne.s32.totalorder %s1056_s1, %s718_s23  ;;  %p722_p1 = scmp.lt.u32.totalorder %s718_s23, %s1056_s1 }
   0x8   :  { %p724_p2 = pnand %p722_p1, %p719_p0 }
   0xa   :  { %727 = shalt.err (!%p724_p2)
}
   0xb   :  { %s728_s28 = scalar_lea.vmem %s38_s18, 1024  ;;  %p733_p4 = scmp.lt.s32.totalorder %s38_s18, %s38_s18 }
   0xc   :  { %p729_p3 = scmp.ne.s32.totalorder %s38_s18, %s728_s28  ;;  %p734_p5 = scmp.lt.s32.totalorder %s728_s28, %s728_s28 }
   0xe   :  { %p735_p6 = por %p734_p5, %p733_p4 }
  0x10   :  { %p736_p7 = pnand %p735_p6, %p729_p3 }
  0x12   :  { %739 = shalt.err (!%p736_p7)
}
  0x13   :  { %s838_s29 = smov 64   ;;  %s839_s30 = smov 4  }
  0x14   :  { %43 = dma.hbm_to_vmem [thread:$0]  %s1056_s1, 1024, %s38_s18, [#allocation6], %s838_s29, %s838_s29, %s839_s30  }
  0x15   :  { %s740_s16 = scalar_lea.hbm %s1055_s0, 128 }
  0x16   :  { %p741_p8 = scmp.ne.s32.totalorder %s1055_s0, %s740_s16  ;;  %p744_p9 = scmp.lt.u32.totalorder %s740_s16, %s1055_s0 }
  0x18   :  { %p746_p10 = pnand %p744_p9, %p741_p8 }
  0x1a   :  { %749 = shalt.err (!%p746_p10)
}
  0x1b   :  { %s750_s23 = scalar_lea.vmem %s907_s20, 128  ;;  %p755_p12 = scmp.lt.s32.totalorder %s907_s20, %s907_s20 }
  0x1c   :  { %p751_p11 = scmp.ne.s32.totalorder %s907_s20, %s750_s23  ;;  %p756_p13 = scmp.lt.s32.totalorder %s750_s23, %s750_s23 }
  0x1e   :  { %p757_p0 = por %p756_p13, %p755_p12 }
  0x20   :  { %p758_p1 = pnand %p757_p0, %p751_p11 }
  0x22   :  { %761 = shalt.err (!%p758_p1)
}
  0x23   :  { %31 = dma.hbm_to_vmem [thread:$0]  %s1055_s0, 128, %s907_s20, [#allocation3], %s838_s29, %s838_s29, %s839_s30  }
  0x24   :  { %s840_s24 = smov [#allocation7]   ;;  %s841_s26 = smov [#allocation8]  }
  0x25   :  { %s55_s25 = sshll.u32 %s840_s24, 4  ;;  %s73_s27 = sshll.u32 %s841_s26, 4  ;;  %s56_s25 = int_to_ptr.vmem [resolvable:$true] %s55_s25  ;;  %s944_s27 = int_to_ptr.vmem [resolvable:$true] %s73_s27 }
  0x26   :  { %s762_s13 = scalar_lea.hbm %s1060_s5, 1024 }
  0x27   :  { %p763_p2 = scmp.ne.s32.totalorder %s1060_s5, %s762_s13  ;;  %p766_p3 = scmp.lt.u32.totalorder %s762_s13, %s1060_s5 }
  0x29   :  { %p768_p4 = pnand %p766_p3, %p763_p2 }
  0x2b   :  { %771 = shalt.err (!%p768_p4)
}
  0x2c   :  { %s772_s0 = scalar_lea.vmem %s56_s25, 1024  ;;  %p777_p6 = scmp.lt.s32.totalorder %s56_s25, %s56_s25 }
  0x2d   :  { %p773_p5 = scmp.ne.s32.totalorder %s56_s25, %s772_s0  ;;  %p778_p7 = scmp.lt.s32.totalorder %s772_s0, %s772_s0 }
  0x2f   :  { %p779_p8 = por %p778_p7, %p777_p6 }
  0x31   :  { %p780_p9 = pnand %p779_p8, %p773_p5 }
  0x33   :  { %783 = shalt.err (!%p780_p9)
}
  0x34   :  { %61 = dma.hbm_to_vmem [thread:$0]  %s1060_s5, 1024, %s56_s25, [#allocation6], %s838_s29, %s838_s29, %s839_s30  }
  0x35   :  { %s784_s23 = scalar_lea.hbm %s1064_s9, 1024 }
  0x36   :  { %p785_p10 = scmp.ne.s32.totalorder %s1064_s9, %s784_s23  ;;  %p788_p11 = scmp.lt.u32.totalorder %s784_s23, %s1064_s9 }
  0x38   :  { %p790_p12 = pnand %p788_p11, %p785_p10 }
  0x3a   :  { %793 = shalt.err (!%p790_p12)
}
  0x3b   :  { %s794_s28 = scalar_lea.vmem %s944_s27, 1024  ;;  %p799_p0 = scmp.lt.s32.totalorder %s944_s27, %s944_s27 }
  0x3c   :  { %p795_p13 = scmp.ne.s32.totalorder %s944_s27, %s794_s28  ;;  %p800_p1 = scmp.lt.s32.totalorder %s794_s28, %s794_s28 }
  0x3e   :  { %p801_p2 = por %p800_p1, %p799_p0 }
  0x40   :  { %p802_p3 = pnand %p801_p2, %p795_p13 }
  0x42   :  { %805 = shalt.err (!%p802_p3)
}
  0x43   :  { %79 = dma.hbm_to_vmem [thread:$0]  %s1064_s9, 1024, %s944_s27, [#allocation9], %s838_s29, %s838_s29, %s839_s30  }
  0x44   :  { %828 = dma.done.wait [#allocation3], 128  }
  0x45   :  { %829 = vsyncadd [#allocation3], 4294967168 }
  0x46   :  { %830 = dma.done.wait [#allocation6], 2048  }
  0x47   :  { %831 = vsyncadd [#allocation6], 4294965248 }
  0x48   :  { %832 = dma.done.wait [#allocation9], 1024  }
  0x49   :  { %833 = vsyncadd [#allocation9], 4294966272  ;;  %v842_v0 = vmov 0.0   ;;  %vm843_vm0 = vmmov 0   ;;  %v685_v1 = vld [vmem:[#allocation5] sm:$0xff]   ;;  %v686_v2 = vld [vmem:[#allocation5 + $0x8] sm:$0xff]   ;;  %v95_v18 = vlaneseq }
  0x4a   :  { %614 = vmatprep.subr.bf16.mxu0 %v842_v0  ;;  %630 = vmatprep.mubr.msk.bf16.mxu0 %vm843_vm0, %v842_v0  ;;  %v687_v3 = vld [vmem:[#allocation5 + $0x10] sm:$0xff]   ;;  %v688_v4 = vld [vmem:[#allocation5 + $0x18] sm:$0xff]   ;;  %v689_v5 = vld [vmem:[#allocation5 + $0x20] sm:$0xff]  }
  0x4b   :  { %634 = vmatprep.subr.bf16.mxu1 %v842_v0  ;;  %650 = vmatprep.mubr.msk.bf16.mxu1 %vm843_vm0, %v842_v0  ;;  %v690_v6 = vld [vmem:[#allocation5 + $0x28] sm:$0xff]   ;;  %v691_v7 = vld [vmem:[#allocation5 + $0x30] sm:$0xff]   ;;  %v692_v8 = vld [vmem:[#allocation5 + $0x38] sm:$0xff]   ;;  %v1001_v19 = vand.u32 127, %v95_v18 }
  0x4c   :  { %615 = vmatpush3.bf16.msra.mxu0 %v685_v1  ;;  %v693_v9 = vld [vmem:[#allocation2] sm:$0xff]   ;;  %v694_v17 = vld [vmem:[#allocation7] sm:$0xff]   ;;  %v695_v30 = vld [vmem:[#allocation7 + $0x8] sm:$0xff]  }
  0x4d   :  { %616 = vmatprep.subr.bf16.mxu0 %v842_v0  ;;  %v555_v10 = vld [vmem:[%s1057_s2] ss:$0 sm:$0xff]  ;;  %635 = vmatpush3.bf16.msra.mxu1 %v694_v17  ;;  %vm97_vm1 = vcmp.lt.s32.totalorder %v1001_v19, 32  ;;  %v696_v31 = vld [vmem:[#allocation7 + $0x10] sm:$0xff]   ;;  %v698_v33 = vld [vmem:[#allocation7 + $0x20] sm:$0xff]  }
  0x4e   :  { %636 = vmatprep.subr.bf16.mxu1 %v842_v0  ;;  %v697_v32 = vld [vmem:[#allocation7 + $0x18] sm:$0xff]   ;;  %v699_v34 = vld [vmem:[#allocation7 + $0x28] sm:$0xff]   ;;  %v700_v35 = vld [vmem:[#allocation7 + $0x30] sm:$0xff]  }
  0x4f   :  { %v701_v36 = vld [vmem:[#allocation7 + $0x38] sm:$0xff]   ;;  %v702_v63 = vld [vmem:[#allocation8] sm:$0xff]  }
  0x50   :  { %617 = vmatpush3.bf16.msra.mxu0 %v686_v2  ;;  %v565_v44 = vld [vmem:[%s1058_s3] ss:$0 sm:$0xff] }
  0x51   :  { %618 = vmatprep.subr.bf16.mxu0 %v842_v0  ;;  %637 = vmatpush3.bf16.msra.mxu1 %v695_v30  ;;  %v566_v48 = vld [vmem:[%s1059_s4] ss:$0 sm:$0xff] }
  0x52   :  { %638 = vmatprep.subr.bf16.mxu1 %v842_v0  ;;  %v567_v56 = vld [vmem:[%s1061_s6] ss:$0 sm:$0xff] }
  0x53   :  { %v709_v17 = vld [vmem:[#allocation8 + $0x38] sm:$0xff]  }
  0x54   :  { %619 = vmatpush3.bf16.msra.mxu0 %v687_v3 }
  0x55   :  { %620 = vmatprep.subr.bf16.mxu0 %v842_v0  ;;  %639 = vmatpush3.bf16.msra.mxu1 %v696_v31 }
  0x56   :  { %640 = vmatprep.subr.bf16.mxu1 %v842_v0 }
  0x58   :  { %621 = vmatpush3.bf16.msra.mxu0 %v688_v4 }
  0x59   :  { %622 = vmatprep.subr.bf16.mxu0 %v842_v0  ;;  %641 = vmatpush3.bf16.msra.mxu1 %v697_v32 }
  0x5a   :  { %642 = vmatprep.subr.bf16.mxu1 %v842_v0 }
  0x5c   :  { %623 = vmatpush3.bf16.msra.mxu0 %v689_v5 }
  0x5d   :  { %624 = vmatprep.subr.bf16.mxu0 %v842_v0  ;;  %643 = vmatpush3.bf16.msra.mxu1 %v698_v33 }
  0x5e   :  { %644 = vmatprep.subr.bf16.mxu1 %v842_v0 }
  0x60   :  { %625 = vmatpush3.bf16.msra.mxu0 %v690_v6 }
  0x61   :  { %626 = vmatprep.subr.bf16.mxu0 %v842_v0  ;;  %645 = vmatpush3.bf16.msra.mxu1 %v699_v34 }
  0x62   :  { %646 = vmatprep.subr.bf16.mxu1 %v842_v0 }
  0x64   :  { %627 = vmatpush3.bf16.msra.mxu0 %v691_v7 }
  0x65   :  { %628 = vmatprep.subr.bf16.mxu0 %v842_v0  ;;  %647 = vmatpush3.bf16.msra.mxu1 %v700_v35 }
  0x66   :  { %648 = vmatprep.subr.bf16.mxu1 %v842_v0 }
  0x68   :  { %629 = vmatpush3.bf16.msra.mxu0 %v692_v8 }
  0x69   :  { %654 = vmatprep.subr.bf16.mxu0 %v842_v0  ;;  %649 = vmatpush3.bf16.msra.mxu1 %v701_v36  ;;  %v578_v36 = vld [vmem:[%s1065_s10] ss:$0 sm:$0xff] }
  0x6b   :  { %631 = vmatmul.mubr.bf16.vlgmr.msra.gmra.mrb[0].mxu0 %v693_v9 }
  0x6c   :  { %670 = vmatprep.mubr.msk.bf16.mxu0 %vm843_vm0, %v842_v0  ;;  %655 = vmatpush3.bf16.msra.mxu0 %v702_v63 }
  0x6d   :  { %656 = vmatprep.subr.bf16.mxu0 %v842_v0 }
 0x13e   :  { %v211_v11 = vpop.f32.mrb[0].mxu0 }
 0x13f   :  { %v212_v12 = vadd.f32 %v555_v10, %v211_v11  ;;  %v632_v13 = vpop.f32.mrb[1].mxu0  ;;  %v703_v11 = vld [vmem:[#allocation8 + $0x8] sm:$0xff]  }
 0x140   :  { %v214_v14 = vpop.f32.mrb[2].mxu0  ;;  %657 = vmatpush3.bf16.msra.mxu0 %v703_v11  ;;  %v705_v13 = vld [vmem:[#allocation8 + $0x18] sm:$0xff]  }
 0x141   :  { %218 = vadd.xlane.f32.xlu0 %v212_v12  ;;  %v633_v15 = vpop.f32.mrb[3].mxu0  ;;  %v215_v16 = vadd.f32 %v555_v10, %v214_v14  ;;  %658 = vmatprep.subr.bf16.mxu0 %v842_v0  ;;  %v706_v14 = vld [vmem:[#allocation8 + $0x20] sm:$0xff]  }
 0x142   :  { %v707_v15 = vld [vmem:[#allocation8 + $0x28] sm:$0xff]  }
 0x145   :  { %220 = vadd.xlane.f32.xlu0 %v215_v16 }
 0x1ce   :  { %v219_v20 = vpop.xlane.xlu0 %218 }
 0x1cf   :  { %v222_v21 = vmul.f32 0.03125, %v219_v20 }
 0x1d1   :  { %v224_v22 = vsub.f32 %v212_v12, %v222_v21  ;;  %v704_v12 = vld [vmem:[#allocation8 + $0x10] sm:$0xff]  }
 0x1d2   :  { %v221_v23 = vpop.xlane.xlu0 %220  ;;  %659 = vmatpush3.bf16.msra.mxu0 %v704_v12 }
 0x1d3   :  { %v223_v24 = vmul.f32 0.03125, %v221_v23  ;;  %v228_v25 = vsel %vm97_vm1, %v224_v22, 0.0  ;;  %660 = vmatprep.subr.bf16.mxu0 %v842_v0 }
 0x1d4   :  { %v230_v26 = vmul.f32 %v228_v25, %v228_v25 }
 0x1d5   :  { %v225_v27 = vsub.f32 %v215_v16, %v223_v24  ;;  %v708_v16 = vld [vmem:[#allocation8 + $0x30] sm:$0xff]  }
 0x1d6   :  { %232 = vadd.xlane.f32.xlu1 %v230_v26  ;;  %661 = vmatpush3.bf16.msra.mxu0 %v705_v13 }
 0x1d7   :  { %v229_v28 = vsel %vm97_vm1, %v225_v27, 0.0  ;;  %662 = vmatprep.subr.bf16.mxu0 %v842_v0 }
 0x1d8   :  { %v231_v29 = vmul.f32 %v229_v28, %v229_v28 }
 0x1da   :  { %234 = vadd.xlane.f32.xlu1 %v231_v29  ;;  %663 = vmatpush3.bf16.msra.mxu0 %v706_v14 }
 0x1db   :  { %664 = vmatprep.subr.bf16.mxu0 %v842_v0 }
 0x1de   :  { %665 = vmatpush3.bf16.msra.mxu0 %v707_v15 }
 0x1df   :  { %666 = vmatprep.subr.bf16.mxu0 %v842_v0 }
 0x1e2   :  { %667 = vmatpush3.bf16.msra.mxu0 %v708_v16 }
 0x1e3   :  { %668 = vmatprep.subr.bf16.mxu0 %v842_v0  ;;  %v577_v0 = vld [vmem:[%s1063_s8] ss:$0 sm:$0xff] }
 0x1e6   :  { %669 = vmatpush3.bf16.msra.mxu0 %v709_v17 }
 0x263   :  { %v233_v37 = vpop.xlane.xlu1 %232 }
 0x264   :  { %v236_v38 = vmul.f32 0.03125, %v233_v37 }
 0x266   :  { %v238_v39 = vadd.f32 1e-05, %v236_v38 }
 0x267   :  { %v235_v40 = vpop.xlane.xlu1 %234 }
 0x268   :  { %710 = vrsqrt.f32 %v238_v39  ;;  %v237_v41 = vmul.f32 0.03125, %v235_v40 }
 0x26a   :  { %v239_v42 = vadd.f32 1e-05, %v237_v41 }
 0x26c   :  { %712 = vrsqrt.f32 %v239_v42 }
 0x272   :  { %v711_v43 = vpop.eup %710 }
 0x273   :  { %v242_v45 = vmul.f32 %v711_v43, %v228_v25  ;;  %v576_v25 = vld [vmem:[%s1062_s7] ss:$0 sm:$0xff]  ;;  %s844_s7 = smov [#allocation10]  }
 0x274   :  { %s541_s0 = sshll.u32 %s844_s7, 4  ;;  %s542_s0 = int_to_ptr.vmem [resolvable:$true] %s541_s0 }
 0x275   :  { %v251_v46 = vmul.f32 %v565_v44, %v242_v45  ;;  %s806_s8 = scalar_lea.vmem %s542_s0, 256  ;;  %p811_p5 = scmp.lt.s32.totalorder %s542_s0, %s542_s0 }
 0x276   :  { %v713_v47 = vpop.eup %712  ;;  %p807_p4 = scmp.ne.s32.totalorder %s542_s0, %s806_s8  ;;  %p812_p6 = scmp.lt.s32.totalorder %s806_s8, %s806_s8 }
 0x277   :  { %v243_v49 = vmul.f32 %v713_v47, %v229_v28  ;;  %v260_v51 = vadd.f32 %v566_v48, %v251_v46 }
 0x278   :  { %p813_p7 = por %p812_p6, %p811_p5 }
 0x279   :  { %v252_v50 = vmul.f32 %v565_v44, %v243_v49  ;;  %v262_v53 = vmax.f32 %v260_v51, 0.0 }
 0x27a   :  { %p814_p8 = pnand %p813_p7, %p807_p4 }
 0x27b   :  { %v261_v52 = vadd.f32 %v566_v48, %v252_v50 }
 0x27d   :  { %v263_v54 = vmax.f32 %v261_v52, 0.0 }
 0x27f   :  { %v264_v55 = vpack.c.bf16 %v263_v54, %v262_v53 }
 0x281   :  { %651 = vmatmul.mubr.bf16.vlgmr.msra.gmra.mrb[0].mxu1 %v264_v55 }
 0x354   :  { %v370_v57 = vpop.f32.mrb[0].mxu1 }
 0x355   :  { %v371_v58 = vadd.f32 %v567_v56, %v370_v57  ;;  %v652_v59 = vpop.f32.mrb[1].mxu1 }
 0x356   :  { %v373_v60 = vpop.f32.mrb[2].mxu1 }
 0x357   :  { %v374_v61 = vadd.f32 %v567_v56, %v373_v60  ;;  %377 = vadd.xlane.f32.xlu0 %v371_v58  ;;  %v653_v62 = vpop.f32.mrb[3].mxu1 }
 0x359   :  { %379 = vadd.xlane.f32.xlu1 %v374_v61 }
 0x3e4   :  { %v378_v1 = vpop.xlane.xlu0 %377 }
 0x3e5   :  { %v381_v2 = vmul.f32 0.03125, %v378_v1 }
 0x3e6   :  { %v380_v3 = vpop.xlane.xlu1 %379 }
 0x3e7   :  { %v383_v4 = vsub.f32 %v371_v58, %v381_v2  ;;  %v382_v5 = vmul.f32 0.03125, %v380_v3 }
 0x3e9   :  { %v384_v6 = vsub.f32 %v374_v61, %v382_v5  ;;  %v385_v7 = vsel %vm97_vm1, %v383_v4, 0.0 }
 0x3ea   :  { %v387_v8 = vmul.f32 %v385_v7, %v385_v7 }
 0x3eb   :  { %v386_v9 = vsel %vm97_vm1, %v384_v6, 0.0 }
 0x3ec   :  { %389 = vadd.xlane.f32.xlu0 %v387_v8  ;;  %v388_v10 = vmul.f32 %v386_v9, %v386_v9 }
 0x3ee   :  { %391 = vadd.xlane.f32.xlu1 %v388_v10 }
 0x479   :  { %v390_v18 = vpop.xlane.xlu0 %389 }
 0x47a   :  { %v393_v19 = vmul.f32 0.03125, %v390_v18 }
 0x47b   :  { %v392_v20 = vpop.xlane.xlu1 %391 }
 0x47c   :  { %v395_v21 = vadd.f32 1e-05, %v393_v19  ;;  %v394_v22 = vmul.f32 0.03125, %v392_v20 }
 0x47e   :  { %714 = vrsqrt.f32 %v395_v21  ;;  %v396_v23 = vadd.f32 1e-05, %v394_v22 }
 0x480   :  { %716 = vrsqrt.f32 %v396_v23 }
 0x488   :  { %v715_v24 = vpop.eup %714 }
 0x489   :  { %v399_v26 = vmul.f32 %v715_v24, %v385_v7 }
 0x48a   :  { %v717_v27 = vpop.eup %716 }
 0x48b   :  { %v400_v28 = vmul.f32 %v717_v27, %v386_v9  ;;  %v408_v29 = vmul.f32 %v576_v25, %v399_v26 }
 0x48d   :  { %v409_v30 = vmul.f32 %v576_v25, %v400_v28  ;;  %v417_v31 = vadd.f32 %v577_v0, %v408_v29 }
 0x48f   :  { %v418_v32 = vadd.f32 %v577_v0, %v409_v30  ;;  %v419_v33 = vmax.f32 %v417_v31, 0.0 }
 0x491   :  { %v420_v34 = vmax.f32 %v418_v32, 0.0 }
 0x493   :  { %v421_v35 = vpack.c.bf16 %v420_v34, %v419_v33 }
 0x495   :  { %671 = vmatmul.mubr.bf16.vlgmr.msra.gmra.mrb[4].mxu0 %v421_v35 }
 0x568   :  { %v527_v37 = vpop.f32.mrb[4].mxu0 }
 0x569   :  { %v528_v38 = vadd.f32 %v578_v36, %v527_v37  ;;  %v672_v39 = vpop.f32.mrb[5].mxu0 }
 0x56a   :  { %v530_v40 = vpop.f32.mrb[6].mxu0 }
 0x56b   :  { %534 = vst [vmem:[#allocation10] sm:$0xff] %v528_v38  ;;  %v531_v41 = vadd.f32 %v578_v36, %v530_v40  ;;  %v673_v42 = vpop.f32.mrb[7].mxu0 }
 0x56d   :  { %535 = vst [vmem:[#allocation10 + $0x8] sm:$0xff] %v531_v41 }
 0x56e   :  { %817 = shalt.err (!%p814_p8)
}
 0x56f   :  { %s818_s19 = scalar_lea.hbm %s1066_s11, 256 }
 0x570   :  { %p819_p9 = scmp.ne.s32.totalorder %s1066_s11, %s818_s19  ;;  %p822_p10 = scmp.lt.u32.totalorder %s818_s19, %s1066_s11 }
 0x572   :  { %p824_p11 = pnand %p822_p10, %p819_p9 }
 0x574   :  { %827 = shalt.err (!%p824_p11)
}
 0x575   :  { %s845_s18 = smov 128   ;;  %s846_s24 = smov 8  }
 0x576   :  { %547 = dma.vmem_to_hbm [thread:$0]  %s542_s0, 256, %s1066_s11, [#allocation4], %s845_s18, %s845_s18, %s846_s24  }
 0x577   :  { %834 = dma.done.wait [#allocation4], 256  }
 0x578   :  { %835 = vsyncadd [#allocation4], 4294967040 }
 0x579   :  { %551 = vsyncpa [#allocation3], 1 }
 0x57a   :  { %552 = vsyncpa [#allocation6], 1 }
 0x57b   :  { %553 = vsyncpa [#allocation9], 1 }
 0x57c   :  { %554 = vsyncpa [#allocation4], 1 }

// kernel: tpu_custom_call.1
= control target key start
LH: loop header
LB: loop body
LE: loop exit
PB: predicated region body
PF: predicated region fallthrough
CT: control target
= control target key end

     0   :  { %16 = vsyncpa [#allocation3], 0  ;;  %s1055_s0 = inlined_call_operand.hbm [shape: bf16[16,128], index: 0, kind: input, shape index: {}]   ;;  %s1056_s1 = inlined_call_operand.hbm [shape: bf16[128,128], index: 1, kind: input, shape index: {}]   ;;  %s1057_s2 = inlined_call_operand.vmem [shape: f32[1,128], index: 2, kind: input, shape index: {}]   ;;  %s1058_s3 = inlined_call_operand.vmem [shape: f32[1,128], index: 3, kind: input, shape index: {}]   ;;  %s1059_s4 = inlined_call_operand.vmem [shape: f32[1,128], index: 4, kind: input, shape index: {}]   ;;  %s1060_s5 = inlined_call_operand.hbm [shape: bf16[128,128], index: 5, kind: input, shape index: {}]   ;;  %s1061_s6 = inlined_call_operand.vmem [shape: f32[1,128], index: 6, kind: input, shape index: {}]   ;;  %s1062_s7 = inlined_call_operand.vmem [shape: f32[1,128], index: 7, kind: input, shape index: {}]   ;;  %s1063_s8 = inlined_call_operand.vmem [shape: f32[1,128], index: 8, kind: input, shape index: {}]   ;;  %s1064_s9 = inlined_call_operand.hbm [shape: bf16[128,128], index: 9, kind: input, shape index: {}]   ;;  %s1065_s10 = inlined_call_operand.vmem [shape: f32[1,128], index: 10, kind: input, shape index: {}]   ;;  %s1066_s11 = inlined_call_operand.hbm [shape: f32[16,128], index: 11, kind: output, shape index: {}]  }
   0x1   :  { %17 = vsyncpa [#allocation6], 0 }
   0x2   :  { %18 = vsyncpa [#allocation9], 0 }
   0x3   :  { %19 = vsyncpa [#allocation4], 0  ;;  %s836_s17 = smov [#allocation5]   ;;  %s837_s19 = smov [#allocation2]  }
   0x4   :  { %s37_s18 = sshll.u32 %s836_s17, 4  ;;  %s25_s20 = sshll.u32 %s837_s19, 4  ;;  %s38_s18 = int_to_ptr.vmem [resolvable:$true] %s37_s18  ;;  %s907_s20 = int_to_ptr.vmem [resolvable:$true] %s25_s20 }
   0x5   :  { %s718_s23 = scalar_lea.hbm %s1056_s1, 1024 }
   0x6   :  { %p719_p0 = scmp.ne.s32.totalorder %s1056_s1, %s718_s23  ;;  %p722_p1 = scmp.lt.u32.totalorder %s718_s23, %s1056_s1 }
   0x8   :  { %p724_p2 = pnand %p722_p1, %p719_p0 }
   0xa   :  { %727 = shalt.err (!%p724_p2)
}
   0xb   :  { %s728_s28 = scalar_lea.vmem %s38_s18, 1024  ;;  %p733_p4 = scmp.lt.s32.totalorder %s38_s18, %s38_s18 }
   0xc   :  { %p729_p3 = scmp.ne.s32.totalorder %s38_s18, %s728_s28  ;;  %p734_p5 = scmp.lt.s32.totalorder %s728_s28, %s728_s28 }
   0xe   :  { %p735_p6 = por %p734_p5, %p733_p4 }
  0x10   :  { %p736_p7 = pnand %p735_p6, %p729_p3 }
  0x12   :  { %739 = shalt.err (!%p736_p7)
}
  0x13   :  { %s838_s29 = smov 64   ;;  %s839_s30 = smov 4  }
  0x14   :  { %43 = dma.hbm_to_vmem [thread:$0]  %s1056_s1, 1024, %s38_s18, [#allocation6], %s838_s29, %s838_s29, %s839_s30  }
  0x15   :  { %s740_s16 = scalar_lea.hbm %s1055_s0, 128 }
  0x16   :  { %p741_p8 = scmp.ne.s32.totalorder %s1055_s0, %s740_s16  ;;  %p744_p9 = scmp.lt.u32.totalorder %s740_s16, %s1055_s0 }
  0x18   :  { %p746_p10 = pnand %p744_p9, %p741_p8 }
  0x1a   :  { %749 = shalt.err (!%p746_p10)
}
  0x1b   :  { %s750_s23 = scalar_lea.vmem %s907_s20, 128  ;;  %p755_p12 = scmp.lt.s32.totalorder %s907_s20, %s907_s20 }
  0x1c   :  { %p751_p11 = scmp.ne.s32.totalorder %s907_s20, %s750_s23  ;;  %p756_p13 = scmp.lt.s32.totalorder %s750_s23, %s750_s23 }
  0x1e   :  { %p757_p0 = por %p756_p13, %p755_p12 }
  0x20   :  { %p758_p1 = pnand %p757_p0, %p751_p11 }
  0x22   :  { %761 = shalt.err (!%p758_p1)
}
  0x23   :  { %31 = dma.hbm_to_vmem [thread:$0]  %s1055_s0, 128, %s907_s20, [#allocation3], %s838_s29, %s838_s29, %s839_s30  }
  0x24   :  { %s840_s24 = smov [#allocation7]   ;;  %s841_s26 = smov [#allocation8]  }
  0x25   :  { %s55_s25 = sshll.u32 %s840_s24, 4  ;;  %s73_s27 = sshll.u32 %s841_s26, 4  ;;  %s56_s25 = int_to_ptr.vmem [resolvable:$true] %s55_s25  ;;  %s944_s27 = int_to_ptr.vmem [resolvable:$true] %s73_s27 }
  0x26   :  { %s762_s13 = scalar_lea.hbm %s1060_s5, 1024 }
  0x27   :  { %p763_p2 = scmp.ne.s32.totalorder %s1060_s5, %s762_s13  ;;  %p766_p3 = scmp.lt.u32.totalorder %s762_s13, %s1060_s5 }
  0x29   :  { %p768_p4 = pnand %p766_p3, %p763_p2 }
  0x2b   :  { %771 = shalt.err (!%p768_p4)
}
  0x2c   :  { %s772_s0 = scalar_lea.vmem %s56_s25, 1024  ;;  %p777_p6 = scmp.lt.s32.totalorder %s56_s25, %s56_s25 }
  0x2d   :  { %p773_p5 = scmp.ne.s32.totalorder %s56_s25, %s772_s0  ;;  %p778_p7 = scmp.lt.s32.totalorder %s772_s0, %s772_s0 }
  0x2f   :  { %p779_p8 = por %p778_p7, %p777_p6 }
  0x31   :  { %p780_p9 = pnand %p779_p8, %p773_p5 }
  0x33   :  { %783 = shalt.err (!%p780_p9)
}
  0x34   :  { %61 = dma.hbm_to_vmem [thread:$0]  %s1060_s5, 1024, %s56_s25, [#allocation6], %s838_s29, %s838_s29, %s839_s30  }
  0x35   :  { %s784_s23 = scalar_lea.hbm %s1064_s9, 1024 }
  0x36   :  { %p785_p10 = scmp.ne.s32.totalorder %s1064_s9, %s784_s23  ;;  %p788_p11 = scmp.lt.u32.totalorder %s784_s23, %s1064_s9 }
  0x38   :  { %p790_p12 = pnand %p788_p11, %p785_p10 }
  0x3a   :  { %793 = shalt.err (!%p790_p12)
}
  0x3b   :  { %s794_s28 = scalar_lea.vmem %s944_s27, 1024  ;;  %p799_p0 = scmp.lt.s32.totalorder %s944_s27, %s944_s27 }
  0x3c   :  { %p795_p13 = scmp.ne.s32.totalorder %s944_s27, %s794_s28  ;;  %p800_p1 = scmp.lt.s32.totalorder %s794_s28, %s794_s28 }
  0x3e   :  { %p801_p2 = por %p800_p1, %p799_p0 }
  0x40   :  { %p802_p3 = pnand %p801_p2, %p795_p13 }
  0x42   :  { %805 = shalt.err (!%p802_p3)
}
  0x43   :  { %79 = dma.hbm_to_vmem [thread:$0]  %s1064_s9, 1024, %s944_s27, [#allocation9], %s838_s29, %s838_s29, %s839_s30  }
  0x44   :  { %828 = dma.done.wait [#allocation3], 128  }
  0x45   :  { %829 = vsyncadd [#allocation3], 4294967168 }
  0x46   :  { %830 = dma.done.wait [#allocation6], 2048  }
  0x47   :  { %831 = vsyncadd [#allocation6], 4294965248 }
  0x48   :  { %832 = dma.done.wait [#allocation9], 1024  }
  0x49   :  { %833 = vsyncadd [#allocation9], 4294966272  ;;  %v842_v0 = vmov 0.0   ;;  %vm843_vm0 = vmmov 0   ;;  %v685_v1 = vld [vmem:[#allocation5] sm:$0xff]   ;;  %v686_v2 = vld [vmem:[#allocation5 + $0x8] sm:$0xff]   ;;  %v95_v18 = vlaneseq }
  0x4a   :  { %614 = vmatprep.subr.bf16.mxu0 %v842_v0  ;;  %630 = vmatprep.mubr.msk.bf16.mxu0 %vm843_vm0, %v842_v0  ;;  %v687_v3 = vld [vmem:[#allocation5 + $0x10] sm:$0xff]   ;;  %v688_v4 = vld [vmem:[#allocation5 + $0x18] sm:$0xff]   ;;  %v689_v5 = vld [vmem:[#allocation5 + $0x20] sm:$0xff]  }
  0x4b   :  { %634 = vmatprep.subr.bf16.mxu1 %v842_v0  ;;  %650 = vmatprep.mubr.msk.bf16.mxu1 %vm843_vm0, %v842_v0  ;;  %v690_v6 = vld [vmem:[#allocation5 + $0x28] sm:$0xff]   ;;  %v691_v7 = vld [vmem:[#allocation5 + $0x30] sm:$0xff]   ;;  %v692_v8 = vld [vmem:[#allocation5 + $0x38] sm:$0xff]   ;;  %v1001_v19 = vand.u32 127, %v95_v18 }
  0x4c   :  { %615 = vmatpush3.bf16.msra.mxu0 %v685_v1  ;;  %v693_v9 = vld [vmem:[#allocation2] sm:$0xff]   ;;  %v694_v17 = vld [vmem:[#allocation7] sm:$0xff]   ;;  %v695_v30 = vld [vmem:[#allocation7 + $0x8] sm:$0xff]  }
  0x4d   :  { %616 = vmatprep.subr.bf16.mxu0 %v842_v0  ;;  %v555_v10 = vld [vmem:[%s1057_s2] ss:$0 sm:$0xff]  ;;  %635 = vmatpush3.bf16.msra.mxu1 %v694_v17  ;;  %vm97_vm1 = vcmp.lt.s32.totalorder %v1001_v19, 32  ;;  %v696_v31 = vld [vmem:[#allocation7 + $0x10] sm:$0xff]   ;;  %v698_v33 = vld [vmem:[#allocation7 + $0x20] sm:$0xff]  }
  0x4e   :  { %636 = vmatprep.subr.bf16.mxu1 %v842_v0  ;;  %v697_v32 = vld [vmem:[#allocation7 + $0x18] sm:$0xff]   ;;  %v699_v34 = vld [vmem:[#allocation7 + $0x28] sm:$0xff]   ;;  %v700_v35 = vld [vmem:[#allocation7 + $0x30] sm:$0xff]  }
  0x4f   :  { %v701_v36 = vld [vmem:[#allocation7 + $0x38] sm:$0xff]   ;;  %v702_v63 = vld [vmem:[#allocation8] sm:$0xff]  }
  0x50   :  { %617 = vmatpush3.bf16.msra.mxu0 %v686_v2  ;;  %v565_v44 = vld [vmem:[%s1058_s3] ss:$0 sm:$0xff] }
  0x51   :  { %618 = vmatprep.subr.bf16.mxu0 %v842_v0  ;;  %637 = vmatpush3.bf16.msra.mxu1 %v695_v30  ;;  %v566_v48 = vld [vmem:[%s1059_s4] ss:$0 sm:$0xff] }
  0x52   :  { %638 = vmatprep.subr.bf16.mxu1 %v842_v0  ;;  %v567_v56 = vld [vmem:[%s1061_s6] ss:$0 sm:$0xff] }
  0x53   :  { %v709_v17 = vld [vmem:[#allocation8 + $0x38] sm:$0xff]  }
  0x54   :  { %619 = vmatpush3.bf16.msra.mxu0 %v687_v3 }
  0x55   :  { %620 = vmatprep.subr.bf16.mxu0 %v842_v0  ;;  %639 = vmatpush3.bf16.msra.mxu1 %v696_v31 }
  0x56   :  { %640 = vmatprep.subr.bf16.mxu1 %v842_v0 }
  0x58   :  { %621 = vmatpush3.bf16.msra.mxu0 %v688_v4 }
  0x59   :  { %622 = vmatprep.subr.bf16.mxu0 %v842_v0  ;;  %641 = vmatpush3.bf16.msra.mxu1 %v697_v32 }
  0x5a   :  { %642 = vmatprep.subr.bf16.mxu1 %v842_v0 }
  0x5c   :  { %623 = vmatpush3.bf16.msra.mxu0 %v689_v5 }
  0x5d   :  { %624 = vmatprep.subr.bf16.mxu0 %v842_v0  ;;  %643 = vmatpush3.bf16.msra.mxu1 %v698_v33 }
  0x5e   :  { %644 = vmatprep.subr.bf16.mxu1 %v842_v0 }
  0x60   :  { %625 = vmatpush3.bf16.msra.mxu0 %v690_v6 }
  0x61   :  { %626 = vmatprep.subr.bf16.mxu0 %v842_v0  ;;  %645 = vmatpush3.bf16.msra.mxu1 %v699_v34 }
  0x62   :  { %646 = vmatprep.subr.bf16.mxu1 %v842_v0 }
  0x64   :  { %627 = vmatpush3.bf16.msra.mxu0 %v691_v7 }
  0x65   :  { %628 = vmatprep.subr.bf16.mxu0 %v842_v0  ;;  %647 = vmatpush3.bf16.msra.mxu1 %v700_v35 }
  0x66   :  { %648 = vmatprep.subr.bf16.mxu1 %v842_v0 }
  0x68   :  { %629 = vmatpush3.bf16.msra.mxu0 %v692_v8 }
  0x69   :  { %654 = vmatprep.subr.bf16.mxu0 %v842_v0  ;;  %649 = vmatpush3.bf16.msra.mxu1 %v701_v36  ;;  %v578_v36 = vld [vmem:[%s1065_s10] ss:$0 sm:$0xff] }
  0x6b   :  { %631 = vmatmul.mubr.bf16.vlgmr.msra.gmra.mrb[0].mxu0 %v693_v9 }
  0x6c   :  { %670 = vmatprep.mubr.msk.bf16.mxu0 %vm843_vm0, %v842_v0  ;;  %655 = vmatpush3.bf16.msra.mxu0 %v702_v63 }
  0x6d   :  { %656 = vmatprep.subr.bf16.mxu0 %v842_v0 }
 0x13e   :  { %v211_v11 = vpop.f32.mrb[0].mxu0 }
 0x13f   :  { %v212_v12 = vadd.f32 %v555_v10, %v211_v11  ;;  %v632_v13 = vpop.f32.mrb[1].mxu0  ;;  %v703_v11 = vld [vmem:[#allocation8 + $0x8] sm:$0xff]  }
 0x140   :  { %v214_v14 = vpop.f32.mrb[2].mxu0  ;;  %657 = vmatpush3.bf16.msra.mxu0 %v703_v11  ;;  %v705_v13 = vld [vmem:[#allocation8 + $0x18] sm:$0xff]  }
 0x141   :  { %218 = vadd.xlane.f32.xlu0 %v212_v12  ;;  %v633_v15 = vpop.f32.mrb[3].mxu0  ;;  %v215_v16 = vadd.f32 %v555_v10, %v214_v14  ;;  %658 = vmatprep.subr.bf16.mxu0 %v842_v0  ;;  %v706_v14 = vld [vmem:[#allocation8 + $0x20] sm:$0xff]  }
 0x142   :  { %v707_v15 = vld [vmem:[#allocation8 + $0x28] sm:$0xff]  }
 0x145   :  { %220 = vadd.xlane.f32.xlu0 %v215_v16 }
 0x1ce   :  { %v219_v20 = vpop.xlane.xlu0 %218 }
 0x1cf   :  { %v222_v21 = vmul.f32 0.03125, %v219_v20 }
 0x1d1   :  { %v224_v22 = vsub.f32 %v212_v12, %v222_v21  ;;  %v704_v12 = vld [vmem:[#allocation8 + $0x10] sm:$0xff]  }
 0x1d2   :  { %v221_v23 = vpop.xlane.xlu0 %220  ;;  %659 = vmatpush3.bf16.msra.mxu0 %v704_v12 }
 0x1d3   :  { %v223_v24 = vmul.f32 0.03125, %v221_v23  ;;  %v228_v25 = vsel %vm97_vm1, %v224_v22, 0.0  ;;  %660 = vmatprep.subr.bf16.mxu0 %v842_v0 }
 0x1d4   :  { %v230_v26 = vmul.f32 %v228_v25, %v228_v25 }
 0x1d5   :  { %v225_v27 = vsub.f32 %v215_v16, %v223_v24  ;;  %v708_v16 = vld [vmem:[#allocation8 + $0x30] sm:$0xff]  }
 0x1d6   :  { %232 = vadd.xlane.f32.xlu1 %v230_v26  ;;  %661 = vmatpush3.bf16.msra.mxu0 %v705_v13 }
 0x1d7   :  { %v229_v28 = vsel %vm97_vm1, %v225_v27, 0.0  ;;  %662 = vmatprep.subr.bf16.mxu0 %v842_v0 }
 0x1d8   :  { %v231_v29 = vmul.f32 %v229_v28, %v229_v28 }
 0x1da   :  { %234 = vadd.xlane.f32.xlu1 %v231_v29  ;;  %663 = vmatpush3.bf16.msra.mxu0 %v706_v14 }
 0x1db   :  { %664 = vmatprep.subr.bf16.mxu0 %v842_v0 }
 0x1de   :  { %665 = vmatpush3.bf16.msra.mxu0 %v707_v15 }
 0x1df   :  { %666 = vmatprep.subr.bf16.mxu0 %v842_v0 }
 0x1e2   :  { %667 = vmatpush3.bf16.msra.mxu0 %v708_v16 }
 0x1e3   :  { %668 = vmatprep.subr.bf16.mxu0 %v842_v0  ;;  %v577_v0 = vld [vmem:[%s1063_s8] ss:$0 sm:$0xff] }
 0x1e6   :  { %669 = vmatpush3.bf16.msra.mxu0 %v709_v17 }
 0x263   :  { %v233_v37 = vpop.xlane.xlu1 %232 }
 0x264   :  { %v236_v38 = vmul.f32 0.03125, %v233_v37 }
 0x266   :  { %v238_v39 = vadd.f32 1e-05, %v236_v38 }
 0x267   :  { %v235_v40 = vpop.xlane.xlu1 %234 }
 0x268   :  { %710 = vrsqrt.f32 %v238_v39  ;;  %v237_v41 = vmul.f32 0.03125, %v235_v40 }
 0x26a   :  { %v239_v42 = vadd.f32 1e-05, %v237_v41 }
 0x26c   :  { %712 = vrsqrt.f32 %v239_v42 }
 0x272   :  { %v711_v43 = vpop.eup %710 }
 0x273   :  { %v242_v45 = vmul.f32 %v711_v43, %v228_v25  ;;  %v576_v25 = vld [vmem:[%s1062_s7] ss:$0 sm:$0xff]  ;;  %s844_s7 = smov [#allocation10]  }
 0x274   :  { %s541_s0 = sshll.u32 %s844_s7, 4  ;;  %s542_s0 = int_to_ptr.vmem [resolvable:$true] %s541_s0 }
 0x275   :  { %v251_v46 = vmul.f32 %v565_v44, %v242_v45  ;;  %s806_s8 = scalar_lea.vmem %s542_s0, 256  ;;  %p811_p5 = scmp.lt.s32.totalorder %s542_s0, %s542_s0 }
 0x276   :  { %v713_v47 = vpop.eup %712  ;;  %p807_p4 = scmp.ne.s32.totalorder %s542_s0, %s806_s8  ;;  %p812_p6 = scmp.lt.s32.totalorder %s806_s8, %s806_s8 }
 0x277   :  { %v243_v49 = vmul.f32 %v713_v47, %v229_v28  ;;  %v260_v51 = vadd.f32 %v566_v48, %v251_v46 }
 0x278   :  { %p813_p7 = por %p812_p6, %p811_p5 }
 0x279   :  { %v252_v50 = vmul.f32 %v565_v44, %v243_v49  ;;  %v262_v53 = vmax.f32 %v260_v51, 0.0 }
 0x27a   :  { %p814_p8 = pnand %p813_p7, %p807_p4 }
 0x27b   :  { %v261_v52 = vadd.f32 %v566_v48, %v252_v50 }
 0x27d   :  { %v263_v54 = vmax.f32 %v261_v52, 0.0 }
 0x27f   :  { %v264_v55 = vpack.c.bf16 %v263_v54, %v262_v53 }
 0x281   :  { %651 = vmatmul.mubr.bf16.vlgmr.msra.gmra.mrb[0].mxu1 %v264_v55 }
 0x354   :  { %v370_v57 = vpop.f32.mrb[0].mxu1 }
 0x355   :  { %v371_v58 = vadd.f32 %v567_v56, %v370_v57  ;;  %v652_v59 = vpop.f32.mrb[1].mxu1 }
 0x356   :  { %v373_v60 = vpop.f32.mrb[2].mxu1 }
 0x357   :  { %v374_v61 = vadd.f32 %v567_v56, %v373_v60  ;;  %377 = vadd.xlane.f32.xlu0 %v371_v58  ;;  %v653_v62 = vpop.f32.mrb[3].mxu1 }
 0x359   :  { %379 = vadd.xlane.f32.xlu1 %v374_v61 }
 0x3e4   :  { %v378_v1 = vpop.xlane.xlu0 %377 }
 0x3e5   :  { %v381_v2 = vmul.f32 0.03125, %v378_v1 }
 0x3e6   :  { %v380_v3 = vpop.xlane.xlu1 %379 }
 0x3e7   :  { %v383_v4 = vsub.f32 %v371_v58, %v381_v2  ;;  %v382_v5 = vmul.f32 0.03125, %v380_v3 }
 0x3e9   :  { %v384_v6 = vsub.f32 %v374_v61, %v382_v5  ;;  %v385_v7 = vsel %vm97_vm1, %v383_v4, 0.0 }
 0x3ea   :  { %v387_v8 = vmul.f32 %v385_v7, %v385_v7 }
 0x3eb   :  { %v386_v9 = vsel %vm97_vm1, %v384_v6, 0.0 }
 0x3ec   :  { %389 = vadd.xlane.f32.xlu0 %v387_v8  ;;  %v388_v10 = vmul.f32 %v386_v9, %v386_v9 }
 0x3ee   :  { %391 = vadd.xlane.f32.xlu1 %v388_v10 }
 0x479   :  { %v390_v18 = vpop.xlane.xlu0 %389 }
 0x47a   :  { %v393_v19 = vmul.f32 0.03125, %v390_v18 }
 0x47b   :  { %v392_v20 = vpop.xlane.xlu1 %391 }
 0x47c   :  { %v395_v21 = vadd.f32 1e-05, %v393_v19  ;;  %v394_v22 = vmul.f32 0.03125, %v392_v20 }
 0x47e   :  { %714 = vrsqrt.f32 %v395_v21  ;;  %v396_v23 = vadd.f32 1e-05, %v394_v22 }
 0x480   :  { %716 = vrsqrt.f32 %v396_v23 }
 0x488   :  { %v715_v24 = vpop.eup %714 }
 0x489   :  { %v399_v26 = vmul.f32 %v715_v24, %v385_v7 }
 0x48a   :  { %v717_v27 = vpop.eup %716 }
 0x48b   :  { %v400_v28 = vmul.f32 %v717_v27, %v386_v9  ;;  %v408_v29 = vmul.f32 %v576_v25, %v399_v26 }
 0x48d   :  { %v409_v30 = vmul.f32 %v576_v25, %v400_v28  ;;  %v417_v31 = vadd.f32 %v577_v0, %v408_v29 }
 0x48f   :  { %v418_v32 = vadd.f32 %v577_v0, %v409_v30  ;;  %v419_v33 = vmax.f32 %v417_v31, 0.0 }
 0x491   :  { %v420_v34 = vmax.f32 %v418_v32, 0.0 }
 0x493   :  { %v421_v35 = vpack.c.bf16 %v420_v34, %v419_v33 }
 0x495   :  { %671 = vmatmul.mubr.bf16.vlgmr.msra.gmra.mrb[4].mxu0 %v421_v35 }
 0x568   :  { %v527_v37 = vpop.f32.mrb[4].mxu0 }
 0x569   :  { %v528_v38 = vadd.f32 %v578_v36, %v527_v37  ;;  %v672_v39 = vpop.f32.mrb[5].mxu0 }
 0x56a   :  { %v530_v40 = vpop.f32.mrb[6].mxu0 }
 0x56b   :  { %534 = vst [vmem:[#allocation10] sm:$0xff] %v528_v38  ;;  %v531_v41 = vadd.f32 %v578_v36, %v530_v40  ;;  %v673_v42 = vpop.f32.mrb[7].mxu0 }
 0x56d   :  { %535 = vst [vmem:[#allocation10 + $0x8] sm:$0xff] %v531_v41 }
 0x56e   :  { %817 = shalt.err (!%p814_p8)
}
 0x56f   :  { %s818_s19 = scalar_lea.hbm %s1066_s11, 256 }
 0x570   :  { %p819_p9 = scmp.ne.s32.totalorder %s1066_s11, %s818_s19  ;;  %p822_p10 = scmp.lt.u32.totalorder %s818_s19, %s1066_s11 }
 0x572   :  { %p824_p11 = pnand %p822_p10, %p819_p9 }
 0x574   :  { %827 = shalt.err (!%p824_p11)
}
 0x575   :  { %s845_s18 = smov 128   ;;  %s846_s24 = smov 8  }
 0x576   :  { %547 = dma.vmem_to_hbm [thread:$0]  %s542_s0, 256, %s1066_s11, [#allocation4], %s845_s18, %s845_s18, %s846_s24  }
 0x577   :  { %834 = dma.done.wait [#allocation4], 256  }
 0x578   :  { %835 = vsyncadd [#allocation4], 4294967040 }
 0x579   :  { %551 = vsyncpa [#allocation3], 1 }
 0x57a   :  { %552 = vsyncpa [#allocation6], 1 }
 0x57b   :  { %553 = vsyncpa [#allocation9], 1 }
 0x57c   :  { %554 = vsyncpa [#allocation4], 1 }

</bundles_post_ra>
